<compile_context>
chip_gen: v7x
topology: tpu7x:2x2x1
jax: 0.10.0
libtpu: 0.0.40
codegen_flags: <defaults>
</compile_context>

<pallas_src>
import functools
import math

import jax
import jax.numpy as jnp
from jax import lax
from jax.experimental import pallas as pl
from jax.experimental.pallas import tpu as pltpu


def _round_up(x, m):
    return ((x + m - 1) // m) * m


def _kan_fused_kernel(x_ref, scale_ref, shift_ref, coef_ref, o_ref, *scratch,
                      n_int, num_k_steps):
    """Fused (folded) BatchNorm-apply + spline expansion + coef matmul.

    x_ref:     (tb, td) f32        raw (un-normalized) input tile
    scale_ref: (1, td)  f32        folded per-feature scale
    shift_ref: (1, td)  f32        folded per-feature shift
    coef_ref:  (K, td, to) f32     coefficient slab, knot-column major
    o_ref:     (tb, to) f32        output tile
    scratch:   optional (tb, to) f32 VMEM accumulator (only if num_k_steps > 1)
    """
    K = coef_ref.shape[0]

    # --- folded BatchNorm + /norm_div_term + *2 - 1, then clip to [-1, 1] ---
    x = jnp.clip(x_ref[...] * scale_ref[...] + shift_ref[...], -1.0, 1.0)

    # --- preactivate(x, n_int, positive=False) ---
    gap = 2.0 / n_int
    u = (x + 1.0) / gap
    uf = jnp.floor(u)
    idx = jnp.minimum(uf, float(n_int - 1)).astype(jnp.int32)
    t = u - uf                      # == ((x+1) mod gap) / gap

    # [t^3, t^2, t, 1] @ matrixA  (cubic B-spline basis matrix / 6)
    t2 = t * t
    t3 = t2 * t
    w = (
        (-t3 + 3.0 * t2 - 3.0 * t + 1.0) * (1.0 / 6.0),
        (3.0 * t3 - 6.0 * t2 + 4.0) * (1.0 / 6.0),
        (-3.0 * t3 + 3.0 * t2 + 3.0 * t + 1.0) * (1.0 / 6.0),
        t3 * (1.0 / 6.0),
    )
    zero = jnp.zeros_like(t)

    # For each knot column c, the basis matrix G_c[b, d] is w[j] when
    # idx[b, d] == c - j (j in 0..3) and 0 otherwise.  This replaces the torch
    # index_put_ one-hot scatter and feeds the MXU directly — the (B, D, K)
    # pre-activation tensor never exists in HBM.  Contributions accumulate in
    # registers and hit the VMEM accumulator once per grid step.
    partial = None
    for c in range(K):
        g = None
        for j in range(3, -1, -1):
            i_val = c - j
            if 0 <= i_val <= n_int - 1:       # trim unreachable branches
                g = jnp.where(idx == i_val, w[j], zero if g is None else g)
        if g is None:
            continue
        contrib = jnp.dot(g, coef_ref[c], preferred_element_type=jnp.float32)
        partial = contrib if partial is None else partial + contrib

    if num_k_steps == 1:
        o_ref[...] = partial
    else:
        acc_ref = scratch[0]
        k = pl.program_id(2)

        @pl.when(k == 0)
        def _():
            acc_ref[...] = partial

        @pl.when(k > 0)
        def _():
            acc_ref[...] += partial

        @pl.when(k == num_k_steps - 1)
        def _():
            o_ref[...] = acc_ref[...]


def kan_layer_forward(x, coef, n_int, norm_div_term=3.0, eps=1e-5):
    """Pallas implementation of KanLayer.forward (norm='bn', affine=False)."""
    shape = x.shape
    D = shape[-1]
    K = n_int + 3
    O = coef.shape[-1]

    xf = x.reshape(-1, D).astype(jnp.float32)
    B = xf.shape[0]

    # --- BatchNorm1d statistics (training mode: batch stats, biased var) ---
    # Hoisted out of the kernel so the batch axis can be tiled freely, then
    # folded with /norm_div_term and *2-1 into a single per-feature affine.
    mean = jnp.mean(xf, axis=0, keepdims=True)                     # (1, D)
    var = jnp.mean(jnp.square(xf - mean), axis=0, keepdims=True)   # (1, D)
    inv_std = lax.rsqrt(var + eps)                                 # (1, D)
    scale = inv_std * (2.0 / norm_div_term)                        # (1, D)
    shift = -mean * scale - 1.0                                    # (1, D)

    # --- tile sizes (kept <= 256 so VMEM stays far below the 32 MiB budget) ---
    if B <= 256:
        tb = _round_up(B, 8)
        B_pad = tb
    else:
        tb = 256
        B_pad = _round_up(B, tb)

    if D <= 256:
        td = D
        D_pad = D
    else:
        td = 256
        D_pad = _round_up(D, td)

    O_pad = _round_up(O, 128)
    to = 256 if (O_pad >= 256 and O_pad % 256 == 0) else 128

    # --- pad operands (padded rows/cols contribute zero via zero-padded coef) ---
    x_p = jnp.pad(xf, ((0, B_pad - B), (0, D_pad - D)))
    scale_p = jnp.pad(scale, ((0, 0), (0, D_pad - D)))
    shift_p = jnp.pad(shift, ((0, 0), (0, D_pad - D)))

    # coef (D, K, O) -> knot-column major (K, D, O), zero-padded to (K, D_pad, O_pad)
    coef_t = jnp.transpose(coef.astype(jnp.float32), (1, 0, 2))
    coef_t = jnp.pad(coef_t, ((0, 0), (0, D_pad - D), (0, O_pad - O)))

    num_k_steps = D_pad // td
    grid = (B_pad // tb, O_pad // to, num_k_steps)

    scratch_shapes = []
    if num_k_steps > 1:
        scratch_shapes.append(pltpu.VMEM((tb, to), jnp.float32))

    out_pad = pl.pallas_call(
        functools.partial(
            _kan_fused_kernel, n_int=n_int, num_k_steps=num_k_steps
        ),
        out_shape=jax.ShapeDtypeStruct((B_pad, O_pad), jnp.float32),
        grid_spec=pltpu.PrefetchScalarGridSpec(
            num_scalar_prefetch=0,
            grid=grid,
            in_specs=[
                pl.BlockSpec((tb, td), lambda i, j, k: (i, k)),        # x
                pl.BlockSpec((1, td), lambda i, j, k: (0, k)),         # scale
                pl.BlockSpec((1, td), lambda i, j, k: (0, k)),         # shift
                pl.BlockSpec((K, td, to), lambda i, j, k: (0, k, j)),  # coef
            ],
            out_specs=pl.BlockSpec((tb, to), lambda i, j, k: (i, j)),
            scratch_shapes=scratch_shapes,
        ),
        compiler_params=pltpu.CompilerParams(
            dimension_semantics=("parallel", "parallel", "arbitrary"),
            vmem_limit_bytes=32 * 1024 * 1024,
        ),
    )(x_p, scale_p, shift_p, coef_t)

    out = out_pad[:B, :O]
    return out.reshape(*shape[:-1], O)


def kan_layer_reference(x, coef, n_int, norm_div_term=3.0, eps=1e-5):
    """Pure-JAX reference mirroring the PyTorch code path (one-hot scatter)."""
    shape = x.shape
    D = shape[-1]
    K = n_int + 3
    O = coef.shape[-1]
    xf = x.reshape(-1, D).astype(jnp.float32)
    B = xf.shape[0]

    mean = jnp.mean(xf, axis=0, keepdims=True)
    var = jnp.mean((xf - mean) ** 2, axis=0, keepdims=True)
    xf = (xf - mean) / jnp.sqrt(var + eps)
    xf = xf / norm_div_term
    xf = xf * 2.0 - 1.0
    xf = jnp.clip(xf, -1.0, 1.0)

    gap = 2.0 / n_int
    flat = xf.reshape(-1)
    idx = jnp.minimum(jnp.floor((flat + 1.0) / gap).astype(jnp.int32), n_int - 1)
    t = jnp.mod(flat + 1.0, gap) / gap

    matrixA = (
        jnp.array(
            [[-1, 3, -3, 1], [3, -6, 3, 0], [-3, 0, 3, 0], [1, 4, 1, 0]],
            dtype=jnp.float32,
        )
        / 6.0
    )
    v = jnp.stack([t**3, t**2, t, jnp.ones_like(t)], axis=-1)  # (N, 4)
    w = v @ matrixA  # (N, 4)
    onehots = jax.nn.one_hot(
        idx[:, None] + jnp.arange(4)[None, :], K, dtype=jnp.float32
    )  # (N, 4, K)
    preact = jnp.einsum("nk,nkj->nj", w, onehots).reshape(B, D * K)
    out = preact @ coef.astype(jnp.float32).reshape(D * K, O)
    return out.reshape(*shape[:-1], O)


if __name__ == "__main__":
    n_int, input_dim, output_dim = 5, 16, 32
    batch, const_dim = 2, 4

    key = jax.random.PRNGKey(0)
    k_coef, k_x = jax.random.split(key)

    # coef ~ U(-cs, cs), cs = sqrt(6)/sqrt(input_dim + output_dim)
    coef_scale = math.sqrt(6.0) / math.sqrt(input_dim + output_dim)
    coef = jax.random.uniform(
        k_coef,
        (input_dim, n_int + 3, output_dim),
        dtype=jnp.float32,
        minval=-coef_scale,
        maxval=coef_scale,
    )
    x = jax.random.normal(k_x, (batch, const_dim, input_dim), dtype=jnp.float32)

    out = kan_layer_forward(x, coef, n_int)
    out = jax.block_until_ready(out)

    ref = kan_layer_reference(x, coef, n_int)
    assert out.shape == (batch, const_dim, output_dim), out.shape
    assert jnp.allclose(out, ref, atol=1e-4, rtol=1e-4), float(
        jnp.max(jnp.abs(out - ref))
    )

    print("KERNEL_OK")
</pallas_src>

<mosaic_0001>
module attributes {stable_mosaic.version = 11 : i64} {
  func.func @_kan_fused_kernel(%arg0: i32, %arg1: i32, %arg2: i32, %arg3: memref<8x16xf32, #tpu.memory_space<vmem>>, %arg4: memref<1x16xf32, #tpu.memory_space<vmem>>, %arg5: memref<1x16xf32, #tpu.memory_space<vmem>>, %arg6: memref<8x16x128xf32, #tpu.memory_space<vmem>>, %arg7: memref<8x128xf32, #tpu.memory_space<vmem>>) attributes {dimension_semantics = [#tpu.dimension_semantics<parallel>, #tpu.dimension_semantics<parallel>, #tpu.dimension_semantics<arbitrary>], iteration_bounds = array<i64: 1, 1, 1>, scalar_prefetch = 0 : i64, scratch_operands = 0 : i64, tpu.core_type = #tpu.core_type<tc>, window_params = [{transform_indices = @transform_0, window_bounds = array<i64: 8, 16>}, {transform_indices = @transform_1, window_bounds = array<i64: 1, 16>}, {transform_indices = @transform_2, window_bounds = array<i64: 1, 16>}, {transform_indices = @transform_3, window_bounds = array<i64: 8, 16, 128>}, {transform_indices = @transform_4, window_bounds = array<i64: 8, 128>}]} {
    %c0 = arith.constant 0 : index
    %c0_0 = arith.constant 0 : index
    %0 = vector.load %arg3[%c0, %c0_0] : memref<8x16xf32, #tpu.memory_space<vmem>>, vector<8x16xf32>
    %c0_1 = arith.constant 0 : index
    %c0_2 = arith.constant 0 : index
    %1 = vector.load %arg4[%c0_1, %c0_2] : memref<1x16xf32, #tpu.memory_space<vmem>>, vector<1x16xf32>
    %2 = vector.broadcast %1 : vector<1x16xf32> to vector<8x16xf32>
    %3 = arith.mulf %0, %2 : vector<8x16xf32>
    %c0_3 = arith.constant 0 : index
    %c0_4 = arith.constant 0 : index
    %4 = vector.load %arg5[%c0_3, %c0_4] : memref<1x16xf32, #tpu.memory_space<vmem>>, vector<1x16xf32>
    %5 = vector.broadcast %4 : vector<1x16xf32> to vector<8x16xf32>
    %6 = arith.addf %3, %5 : vector<8x16xf32>
    %cst = arith.constant -1.000000e+00 : f32
    %cst_5 = arith.constant 1.000000e+00 : f32
    %7 = vector.broadcast %cst : f32 to vector<8x16xf32>
    %8 = arith.maximumf %7, %6 : vector<8x16xf32>
    %9 = vector.broadcast %cst_5 : f32 to vector<8x16xf32>
    %10 = arith.minimumf %9, %8 : vector<8x16xf32>
    %cst_6 = arith.constant 1.000000e+00 : f32
    %11 = vector.broadcast %cst_6 : f32 to vector<8x16xf32>
    %12 = arith.addf %10, %11 : vector<8x16xf32>
    %cst_7 = arith.constant 4.000000e-01 : f32
    %13 = vector.broadcast %cst_7 : f32 to vector<8x16xf32>
    %14 = arith.divf %12, %13 : vector<8x16xf32>
    %15 = math.floor %14 : vector<8x16xf32>
    %cst_8 = arith.constant 4.000000e+00 : f32
    %16 = vector.broadcast %cst_8 : f32 to vector<8x16xf32>
    %17 = arith.minimumf %15, %16 : vector<8x16xf32>
    %18 = arith.fptosi %17 : vector<8x16xf32> to vector<8x16xi32>
    %19 = arith.subf %14, %15 : vector<8x16xf32>
    %20 = arith.mulf %19, %19 : vector<8x16xf32>
    %21 = arith.mulf %20, %19 : vector<8x16xf32>
    %cst_9 = arith.constant 0.000000e+00 : f32
    %22 = vector.broadcast %cst_9 : f32 to vector<8x16xf32>
    %23 = arith.subf %22, %21 : vector<8x16xf32>
    %cst_10 = arith.constant 3.000000e+00 : f32
    %24 = vector.broadcast %cst_10 : f32 to vector<8x16xf32>
    %25 = arith.mulf %24, %20 : vector<8x16xf32>
    %26 = arith.addf %23, %25 : vector<8x16xf32>
    %cst_11 = arith.constant 3.000000e+00 : f32
    %27 = vector.broadcast %cst_11 : f32 to vector<8x16xf32>
    %28 = arith.mulf %27, %19 : vector<8x16xf32>
    %29 = arith.subf %26, %28 : vector<8x16xf32>
    %cst_12 = arith.constant 1.000000e+00 : f32
    %30 = vector.broadcast %cst_12 : f32 to vector<8x16xf32>
    %31 = arith.addf %29, %30 : vector<8x16xf32>
    %cst_13 = arith.constant 0.166666672 : f32
    %32 = vector.broadcast %cst_13 : f32 to vector<8x16xf32>
    %33 = arith.mulf %31, %32 : vector<8x16xf32>
    %cst_14 = arith.constant 3.000000e+00 : f32
    %34 = vector.broadcast %cst_14 : f32 to vector<8x16xf32>
    %35 = arith.mulf %34, %21 : vector<8x16xf32>
    %cst_15 = arith.constant 6.000000e+00 : f32
    %36 = vector.broadcast %cst_15 : f32 to vector<8x16xf32>
    %37 = arith.mulf %36, %20 : vector<8x16xf32>
    %38 = arith.subf %35, %37 : vector<8x16xf32>
    %cst_16 = arith.constant 4.000000e+00 : f32
    %39 = vector.broadcast %cst_16 : f32 to vector<8x16xf32>
    %40 = arith.addf %38, %39 : vector<8x16xf32>
    %cst_17 = arith.constant 0.166666672 : f32
    %41 = vector.broadcast %cst_17 : f32 to vector<8x16xf32>
    %42 = arith.mulf %40, %41 : vector<8x16xf32>
    %cst_18 = arith.constant -3.000000e+00 : f32
    %43 = vector.broadcast %cst_18 : f32 to vector<8x16xf32>
    %44 = arith.mulf %43, %21 : vector<8x16xf32>
    %cst_19 = arith.constant 3.000000e+00 : f32
    %45 = vector.broadcast %cst_19 : f32 to vector<8x16xf32>
    %46 = arith.mulf %45, %20 : vector<8x16xf32>
    %47 = arith.addf %44, %46 : vector<8x16xf32>
    %cst_20 = arith.constant 3.000000e+00 : f32
    %48 = vector.broadcast %cst_20 : f32 to vector<8x16xf32>
    %49 = arith.mulf %48, %19 : vector<8x16xf32>
    %50 = arith.addf %47, %49 : vector<8x16xf32>
    %cst_21 = arith.constant 1.000000e+00 : f32
    %51 = vector.broadcast %cst_21 : f32 to vector<8x16xf32>
    %52 = arith.addf %50, %51 : vector<8x16xf32>
    %cst_22 = arith.constant 0.166666672 : f32
    %53 = vector.broadcast %cst_22 : f32 to vector<8x16xf32>
    %54 = arith.mulf %52, %53 : vector<8x16xf32>
    %cst_23 = arith.constant 0.166666672 : f32
    %55 = vector.broadcast %cst_23 : f32 to vector<8x16xf32>
    %56 = arith.mulf %21, %55 : vector<8x16xf32>
    %cst_24 = arith.constant 0.000000e+00 : f32
    %57 = vector.broadcast %cst_24 : f32 to vector<8x16xf32>
    %c0_i32 = arith.constant 0 : i32
    %58 = vector.broadcast %c0_i32 : i32 to vector<8x16xi32>
    %59 = arith.cmpi eq, %18, %58 : vector<8x16xi32>
    %60 = arith.select %59, %33, %57 : vector<8x16xi1>, vector<8x16xf32>
    %c0_25 = arith.constant 0 : index
    %c0_26 = arith.constant 0 : index
    %c0_27 = arith.constant 0 : index
    %61 = vector.load %arg6[%c0_25, %c0_26, %c0_27] : memref<8x16x128xf32, #tpu.memory_space<vmem>>, vector<1x16x128xf32>
    %62 = vector.shape_cast %61 : vector<1x16x128xf32> to vector<16x128xf32>
    %cst_28 = arith.constant dense<0.000000e+00> : vector<8x128xf32>
    %63 = tpu.matmul %60, %62, %cst_28 {dimension_numbers = #tpu.dot_dimension_numbers<[1], [0], [0], [1], [0, 0, 1, 1], [], []>} : vector<8x16xf32>, vector<16x128xf32>, vector<8x128xf32> -> vector<8x128xf32>
    %c0_i32_29 = arith.constant 0 : i32
    %64 = vector.broadcast %c0_i32_29 : i32 to vector<8x16xi32>
    %65 = arith.cmpi eq, %18, %64 : vector<8x16xi32>
    %66 = arith.select %65, %42, %57 : vector<8x16xi1>, vector<8x16xf32>
    %c1_i32 = arith.constant 1 : i32
    %67 = vector.broadcast %c1_i32 : i32 to vector<8x16xi32>
    %68 = arith.cmpi eq, %18, %67 : vector<8x16xi32>
    %69 = arith.select %68, %33, %66 : vector<8x16xi1>, vector<8x16xf32>
    %c1 = arith.constant 1 : index
    %c0_30 = arith.constant 0 : index
    %c0_31 = arith.constant 0 : index
    %70 = vector.load %arg6[%c1, %c0_30, %c0_31] : memref<8x16x128xf32, #tpu.memory_space<vmem>>, vector<1x16x128xf32>
    %71 = vector.shape_cast %70 : vector<1x16x128xf32> to vector<16x128xf32>
    %cst_32 = arith.constant dense<0.000000e+00> : vector<8x128xf32>
    %72 = tpu.matmul %69, %71, %cst_32 {dimension_numbers = #tpu.dot_dimension_numbers<[1], [0], [0], [1], [0, 0, 1, 1], [], []>} : vector<8x16xf32>, vector<16x128xf32>, vector<8x128xf32> -> vector<8x128xf32>
    %73 = arith.addf %63, %72 : vector<8x128xf32>
    %c0_i32_33 = arith.constant 0 : i32
    %74 = vector.broadcast %c0_i32_33 : i32 to vector<8x16xi32>
    %75 = arith.cmpi eq, %18, %74 : vector<8x16xi32>
    %76 = arith.select %75, %54, %57 : vector<8x16xi1>, vector<8x16xf32>
    %c1_i32_34 = arith.constant 1 : i32
    %77 = vector.broadcast %c1_i32_34 : i32 to vector<8x16xi32>
    %78 = arith.cmpi eq, %18, %77 : vector<8x16xi32>
    %79 = arith.select %78, %42, %76 : vector<8x16xi1>, vector<8x16xf32>
    %c2_i32 = arith.constant 2 : i32
    %80 = vector.broadcast %c2_i32 : i32 to vector<8x16xi32>
    %81 = arith.cmpi eq, %18, %80 : vector<8x16xi32>
    %82 = arith.select %81, %33, %79 : vector<8x16xi1>, vector<8x16xf32>
    %c2 = arith.constant 2 : index
    %c0_35 = arith.constant 0 : index
    %c0_36 = arith.constant 0 : index
    %83 = vector.load %arg6[%c2, %c0_35, %c0_36] : memref<8x16x128xf32, #tpu.memory_space<vmem>>, vector<1x16x128xf32>
    %84 = vector.shape_cast %83 : vector<1x16x128xf32> to vector<16x128xf32>
    %cst_37 = arith.constant dense<0.000000e+00> : vector<8x128xf32>
    %85 = tpu.matmul %82, %84, %cst_37 {dimension_numbers = #tpu.dot_dimension_numbers<[1], [0], [0], [1], [0, 0, 1, 1], [], []>} : vector<8x16xf32>, vector<16x128xf32>, vector<8x128xf32> -> vector<8x128xf32>
    %86 = arith.addf %73, %85 : vector<8x128xf32>
    %c0_i32_38 = arith.constant 0 : i32
    %87 = vector.broadcast %c0_i32_38 : i32 to vector<8x16xi32>
    %88 = arith.cmpi eq, %18, %87 : vector<8x16xi32>
    %89 = arith.select %88, %56, %57 : vector<8x16xi1>, vector<8x16xf32>
    %c1_i32_39 = arith.constant 1 : i32
    %90 = vector.broadcast %c1_i32_39 : i32 to vector<8x16xi32>
    %91 = arith.cmpi eq, %18, %90 : vector<8x16xi32>
    %92 = arith.select %91, %54, %89 : vector<8x16xi1>, vector<8x16xf32>
    %c2_i32_40 = arith.constant 2 : i32
    %93 = vector.broadcast %c2_i32_40 : i32 to vector<8x16xi32>
    %94 = arith.cmpi eq, %18, %93 : vector<8x16xi32>
    %95 = arith.select %94, %42, %92 : vector<8x16xi1>, vector<8x16xf32>
    %c3_i32 = arith.constant 3 : i32
    %96 = vector.broadcast %c3_i32 : i32 to vector<8x16xi32>
    %97 = arith.cmpi eq, %18, %96 : vector<8x16xi32>
    %98 = arith.select %97, %33, %95 : vector<8x16xi1>, vector<8x16xf32>
    %c3 = arith.constant 3 : index
    %c0_41 = arith.constant 0 : index
    %c0_42 = arith.constant 0 : index
    %99 = vector.load %arg6[%c3, %c0_41, %c0_42] : memref<8x16x128xf32, #tpu.memory_space<vmem>>, vector<1x16x128xf32>
    %100 = vector.shape_cast %99 : vector<1x16x128xf32> to vector<16x128xf32>
    %cst_43 = arith.constant dense<0.000000e+00> : vector<8x128xf32>
    %101 = tpu.matmul %98, %100, %cst_43 {dimension_numbers = #tpu.dot_dimension_numbers<[1], [0], [0], [1], [0, 0, 1, 1], [], []>} : vector<8x16xf32>, vector<16x128xf32>, vector<8x128xf32> -> vector<8x128xf32>
    %102 = arith.addf %86, %101 : vector<8x128xf32>
    %c1_i32_44 = arith.constant 1 : i32
    %103 = vector.broadcast %c1_i32_44 : i32 to vector<8x16xi32>
    %104 = arith.cmpi eq, %18, %103 : vector<8x16xi32>
    %105 = arith.select %104, %56, %57 : vector<8x16xi1>, vector<8x16xf32>
    %c2_i32_45 = arith.constant 2 : i32
    %106 = vector.broadcast %c2_i32_45 : i32 to vector<8x16xi32>
    %107 = arith.cmpi eq, %18, %106 : vector<8x16xi32>
    %108 = arith.select %107, %54, %105 : vector<8x16xi1>, vector<8x16xf32>
    %c3_i32_46 = arith.constant 3 : i32
    %109 = vector.broadcast %c3_i32_46 : i32 to vector<8x16xi32>
    %110 = arith.cmpi eq, %18, %109 : vector<8x16xi32>
    %111 = arith.select %110, %42, %108 : vector<8x16xi1>, vector<8x16xf32>
    %c4_i32 = arith.constant 4 : i32
    %112 = vector.broadcast %c4_i32 : i32 to vector<8x16xi32>
    %113 = arith.cmpi eq, %18, %112 : vector<8x16xi32>
    %114 = arith.select %113, %33, %111 : vector<8x16xi1>, vector<8x16xf32>
    %c4 = arith.constant 4 : index
    %c0_47 = arith.constant 0 : index
    %c0_48 = arith.constant 0 : index
    %115 = vector.load %arg6[%c4, %c0_47, %c0_48] : memref<8x16x128xf32, #tpu.memory_space<vmem>>, vector<1x16x128xf32>
    %116 = vector.shape_cast %115 : vector<1x16x128xf32> to vector<16x128xf32>
    %cst_49 = arith.constant dense<0.000000e+00> : vector<8x128xf32>
    %117 = tpu.matmul %114, %116, %cst_49 {dimension_numbers = #tpu.dot_dimension_numbers<[1], [0], [0], [1], [0, 0, 1, 1], [], []>} : vector<8x16xf32>, vector<16x128xf32>, vector<8x128xf32> -> vector<8x128xf32>
    %118 = arith.addf %102, %117 : vector<8x128xf32>
    %c2_i32_50 = arith.constant 2 : i32
    %119 = vector.broadcast %c2_i32_50 : i32 to vector<8x16xi32>
    %120 = arith.cmpi eq, %18, %119 : vector<8x16xi32>
    %121 = arith.select %120, %56, %57 : vector<8x16xi1>, vector<8x16xf32>
    %c3_i32_51 = arith.constant 3 : i32
    %122 = vector.broadcast %c3_i32_51 : i32 to vector<8x16xi32>
    %123 = arith.cmpi eq, %18, %122 : vector<8x16xi32>
    %124 = arith.select %123, %54, %121 : vector<8x16xi1>, vector<8x16xf32>
    %c4_i32_52 = arith.constant 4 : i32
    %125 = vector.broadcast %c4_i32_52 : i32 to vector<8x16xi32>
    %126 = arith.cmpi eq, %18, %125 : vector<8x16xi32>
    %127 = arith.select %126, %42, %124 : vector<8x16xi1>, vector<8x16xf32>
    %c5 = arith.constant 5 : index
    %c0_53 = arith.constant 0 : index
    %c0_54 = arith.constant 0 : index
    %128 = vector.load %arg6[%c5, %c0_53, %c0_54] : memref<8x16x128xf32, #tpu.memory_space<vmem>>, vector<1x16x128xf32>
    %129 = vector.shape_cast %128 : vector<1x16x128xf32> to vector<16x128xf32>
    %cst_55 = arith.constant dense<0.000000e+00> : vector<8x128xf32>
    %130 = tpu.matmul %127, %129, %cst_55 {dimension_numbers = #tpu.dot_dimension_numbers<[1], [0], [0], [1], [0, 0, 1, 1], [], []>} : vector<8x16xf32>, vector<16x128xf32>, vector<8x128xf32> -> vector<8x128xf32>
    %131 = arith.addf %118, %130 : vector<8x128xf32>
    %c3_i32_56 = arith.constant 3 : i32
    %132 = vector.broadcast %c3_i32_56 : i32 to vector<8x16xi32>
    %133 = arith.cmpi eq, %18, %132 : vector<8x16xi32>
    %134 = arith.select %133, %56, %57 : vector<8x16xi1>, vector<8x16xf32>
    %c4_i32_57 = arith.constant 4 : i32
    %135 = vector.broadcast %c4_i32_57 : i32 to vector<8x16xi32>
    %136 = arith.cmpi eq, %18, %135 : vector<8x16xi32>
    %137 = arith.select %136, %54, %134 : vector<8x16xi1>, vector<8x16xf32>
    %c6 = arith.constant 6 : index
    %c0_58 = arith.constant 0 : index
    %c0_59 = arith.constant 0 : index
    %138 = vector.load %arg6[%c6, %c0_58, %c0_59] : memref<8x16x128xf32, #tpu.memory_space<vmem>>, vector<1x16x128xf32>
    %139 = vector.shape_cast %138 : vector<1x16x128xf32> to vector<16x128xf32>
    %cst_60 = arith.constant dense<0.000000e+00> : vector<8x128xf32>
    %140 = tpu.matmul %137, %139, %cst_60 {dimension_numbers = #tpu.dot_dimension_numbers<[1], [0], [0], [1], [0, 0, 1, 1], [], []>} : vector<8x16xf32>, vector<16x128xf32>, vector<8x128xf32> -> vector<8x128xf32>
    %141 = arith.addf %131, %140 : vector<8x128xf32>
    %c4_i32_61 = arith.constant 4 : i32
    %142 = vector.broadcast %c4_i32_61 : i32 to vector<8x16xi32>
    %143 = arith.cmpi eq, %18, %142 : vector<8x16xi32>
    %144 = arith.select %143, %56, %57 : vector<8x16xi1>, vector<8x16xf32>
    %c7 = arith.constant 7 : index
    %c0_62 = arith.constant 0 : index
    %c0_63 = arith.constant 0 : index
    %145 = vector.load %arg6[%c7, %c0_62, %c0_63] : memref<8x16x128xf32, #tpu.memory_space<vmem>>, vector<1x16x128xf32>
    %146 = vector.shape_cast %145 : vector<1x16x128xf32> to vector<16x128xf32>
    %cst_64 = arith.constant dense<0.000000e+00> : vector<8x128xf32>
    %147 = tpu.matmul %144, %146, %cst_64 {dimension_numbers = #tpu.dot_dimension_numbers<[1], [0], [0], [1], [0, 0, 1, 1], [], []>} : vector<8x16xf32>, vector<16x128xf32>, vector<8x128xf32> -> vector<8x128xf32>
    %148 = arith.addf %141, %147 : vector<8x128xf32>
    %c0_65 = arith.constant 0 : index
    %c0_66 = arith.constant 0 : index
    %149 = vector.load %arg7[%c0_65, %c0_66] : memref<8x128xf32, #tpu.memory_space<vmem>>, vector<8x128xf32>
    tpu.vector_store %arg7[%c0_65, %c0_66], %148 {strides = array<i32>} : memref<8x128xf32, #tpu.memory_space<vmem>>, vector<8x128xf32>,
    return
  }
  func.func @transform_0(%arg0: i32, %arg1: i32, %arg2: i32) -> (i32, i32) {
    %c0_i32 = arith.constant 0 : i32
    return %arg0, %arg2 : i32, i32
  }
  func.func @transform_1(%arg0: i32, %arg1: i32, %arg2: i32) -> (i32, i32) {
    %c0_i32 = arith.constant 0 : i32
    %c0_i32_0 = arith.constant 0 : i32
    return %c0_i32, %arg2 : i32, i32
  }
  func.func @transform_2(%arg0: i32, %arg1: i32, %arg2: i32) -> (i32, i32) {
    %c0_i32 = arith.constant 0 : i32
    %c0_i32_0 = arith.constant 0 : i32
    return %c0_i32, %arg2 : i32, i32
  }
  func.func @transform_3(%arg0: i32, %arg1: i32, %arg2: i32) -> (i32, i32, i32) {
    %c0_i32 = arith.constant 0 : i32
    %c0_i32_0 = arith.constant 0 : i32
    return %c0_i32, %arg2, %arg1 : i32, i32, i32
  }
  func.func @transform_4(%arg0: i32, %arg1: i32, %arg2: i32) -> (i32, i32) {
    %c0_i32 = arith.constant 0 : i32
    return %arg0, %arg1 : i32, i32
  }
}

</mosaic_0001>

<bundles_post_ra>
// kernel: tpu_custom_call.1
= control target key start
LH: loop header
LB: loop body
LE: loop exit
PB: predicated region body
PF: predicated region fallthrough
CT: control target
= control target key end

     0   :  { %9 = vsyncpa [#allocation3], 0  ;;  %s1124_s0 = inlined_call_operand.hbm [shape: f32[8,16], index: 0, kind: input, shape index: {}]   ;;  %s1125_s1 = inlined_call_operand.vmem [shape: f32[1,16], index: 1, kind: input, shape index: {}]   ;;  %s1126_s2 = inlined_call_operand.vmem [shape: f32[1,16], index: 2, kind: input, shape index: {}]   ;;  %s1127_s3 = inlined_call_operand.hbm [shape: f32[8,16,128], index: 3, kind: input, shape index: {}]   ;;  %s1128_s4 = inlined_call_operand.hbm [shape: f32[8,128], index: 4, kind: output, shape index: {}]  }
   0x1   :  { %10 = vsyncpa [#allocation6], 0 }
   0x2   :  { %11 = vsyncpa [#allocation4], 0  ;;  %s956_s15 = smov [#allocation2]   ;;  %s957_s17 = smov [#allocation5]  }
   0x3   :  { %s18_s16 = sshll.u32 %s956_s15, 4  ;;  %s31_s18 = sshll.u32 %s957_s17, 4  ;;  %s19_s16 = int_to_ptr.vmem [resolvable:$true] %s18_s16  ;;  %s989_s18 = int_to_ptr.vmem [resolvable:$true] %s31_s18 }
   0x4   :  { %s884_s21 = scalar_lea.hbm %s1124_s0, 128 }
   0x5   :  { %p885_p0 = scmp.ne.s32.totalorder %s1124_s0, %s884_s21  ;;  %p888_p1 = scmp.lt.u32.totalorder %s884_s21, %s1124_s0 }
   0x7   :  { %p890_p2 = pnand %p888_p1, %p885_p0 }
   0x9   :  { %893 = shalt.err (!%p890_p2)
}
   0xa   :  { %s894_s26 = scalar_lea.vmem %s19_s16, 128  ;;  %p899_p4 = scmp.lt.s32.totalorder %s19_s16, %s19_s16 }
   0xb   :  { %p895_p3 = scmp.ne.s32.totalorder %s19_s16, %s894_s26  ;;  %p900_p5 = scmp.lt.s32.totalorder %s894_s26, %s894_s26 }
   0xd   :  { %p901_p6 = por %p900_p5, %p899_p4 }
   0xf   :  { %p902_p7 = pnand %p901_p6, %p895_p3 }
  0x11   :  { %905 = shalt.err (!%p902_p7)
}
  0x12   :  { %21 = dma.hbm_to_vmem [thread:$0]  %s1124_s0, 128, %s19_s16, [#allocation3]  }
  0x13   :  { %s906_s5 = scalar_lea.hbm %s1127_s3, 2048 }
  0x14   :  { %p907_p8 = scmp.ne.s32.totalorder %s1127_s3, %s906_s5  ;;  %p910_p9 = scmp.lt.u32.totalorder %s906_s5, %s1127_s3 }
  0x16   :  { %p912_p10 = pnand %p910_p9, %p907_p8 }
  0x18   :  { %915 = shalt.err (!%p912_p10)
}
  0x19   :  { %s916_s10 = scalar_lea.vmem %s989_s18, 2048  ;;  %p921_p12 = scmp.lt.s32.totalorder %s989_s18, %s989_s18 }
  0x1a   :  { %p917_p11 = scmp.ne.s32.totalorder %s989_s18, %s916_s10  ;;  %p922_p13 = scmp.lt.s32.totalorder %s916_s10, %s916_s10 }
  0x1c   :  { %p923_p0 = por %p922_p13, %p921_p12 }
  0x1e   :  { %p924_p1 = pnand %p923_p0, %p917_p11 }
  0x20   :  { %927 = shalt.err (!%p924_p1)
}
  0x21   :  { %s958_s0 = smov 128   ;;  %s959_s11 = smov 8  }
  0x22   :  { %37 = dma.hbm_to_vmem [thread:$0]  %s1127_s3, 2048, %s989_s18, [#allocation6], %s958_s0, %s958_s0, %s959_s11  }
  0x23   :  { %950 = dma.done.wait [#allocation3], 128  }
  0x24   :  { %951 = vsyncadd [#allocation3], 4294967168 }
  0x25   :  { %952 = dma.done.wait [#allocation6], 2048  }
  0x26   :  { %953 = vsyncadd [#allocation6], 4294965248  ;;  %v960_v0 = vmov 0.0|0.0   ;;  %vm961_vm0 = vmmov 0   ;;  %v962_v1 = vmov 0.0   ;;  %v98_v2 = vld [vmem:[#allocation5 + $0x10] sm:$0xff] }
  0x27   :  { %837 = vmatprep.subr.bf16.mxu1 %v960_v0  ;;  %849 = vmatprep.subr.bf16.mxu0 %v960_v0  ;;  %v99_v3 = vld [vmem:[#allocation5 + $0x18] sm:$0xff]  ;;  %v416_v4 = vld [vmem:[#allocation5 + $0x40] sm:$0xff]  ;;  %v417_v6 = vld [vmem:[#allocation5 + $0x48] sm:$0xff]  ;;  %vm100_vm3 = vcmask 130048  }
  0x28   :  { %785 = vmatprep.mubr.msk.f32.mxu1 %vm961_vm0, %v962_v1  ;;  %813 = vmatprep.mubr.msk.f32.mxu0 %vm961_vm0, %v962_v1  ;;  %v838_v5 = vpack.c.bf16 %v99_v3, %v98_v2  ;;  %v44_v7 = vld [vmem:[#allocation2] sm:$0xff]  ;;  %v850_v9 = vpack.c.bf16 %v417_v6, %v416_v4  ;;  %v92_v36 = vld [vmem:[#allocation5] sm:$0xff]  ;;  %v93_v37 = vld [vmem:[#allocation5 + $0x8] sm:$0xff] }
  0x29   :  { %v746_v8 = vld [vmem:[%s1125_s1] ss:$0 sm:$0xff]  ;;  %v841_v41 = vpack.c.bf16 %v93_v37, %v92_v36  ;;  %v496_v43 = vld [vmem:[#allocation5 + $0x50] sm:$0xff]  ;;  %v252_v54 = vld [vmem:[#allocation5 + $0x20] sm:$0xff]  ;;  %s963_s1 = smov [#allocation7]  }
  0x2a   :  { %v52_v10 = vmul.f32 %v746_v8, %v44_v7  ;;  %v747_v11 = vld [vmem:[%s1126_s2] ss:$0 sm:$0xff]  ;;  %839 = vmatpush3.bf16.msra.mxu1 %v838_v5  ;;  %851 = vmatpush3.bf16.msra.mxu0 %v850_v9  ;;  %v253_v55 = vld [vmem:[#allocation5 + $0x28] sm:$0xff]  ;;  %v575_v57 = vld [vmem:[#allocation5 + $0x60] sm:$0xff]  ;;  %s736_s2 = sshll.u32 %s963_s1, 4  ;;  %s737_s2 = int_to_ptr.vmem [resolvable:$true] %s736_s2 }
  0x2b   :  { %840 = vmatprep.subr.bf16.mxu1 %v960_v0  ;;  %852 = vmatprep.subr.bf16.mxu0 %v960_v0  ;;  %v497_v44 = vld [vmem:[#allocation5 + $0x58] sm:$0xff]  ;;  %v576_v58 = vld [vmem:[#allocation5 + $0x68] sm:$0xff]  ;;  %v844_v60 = vpack.c.bf16 %v253_v55, %v252_v54  ;;  %v334_v3 = vld [vmem:[#allocation5 + $0x30] sm:$0xff]  ;;  %s928_s17 = scalar_lea.vmem %s737_s2, 128  ;;  %p933_p3 = scmp.lt.s32.totalorder %s737_s2, %s737_s2 }
  0x2c   :  { %v60_v12 = vadd.f32 %v747_v11, %v52_v10  ;;  %v853_v50 = vpack.c.bf16 %v497_v44, %v496_v43  ;;  %v856_v62 = vpack.c.bf16 %v576_v58, %v575_v57  ;;  %v335_v4 = vld [vmem:[#allocation5 + $0x38] sm:$0xff]  ;;  %v653_v6 = vld [vmem:[#allocation5 + $0x70] sm:$0xff]  ;;  %p929_p2 = scmp.ne.s32.totalorder %s737_s2, %s928_s17  ;;  %p934_p4 = scmp.lt.s32.totalorder %s928_s17, %s928_s17 }
  0x2d   :  { %v654_v7 = vld [vmem:[#allocation5 + $0x78] sm:$0xff]  ;;  %v847_v10 = vpack.c.bf16 %v335_v4, %v334_v3 }
  0x2e   :  { %v748_v13 = vclamps-f32 %v60_v12, 1.0  ;;  %v859_v12 = vpack.c.bf16 %v654_v7, %v653_v6  ;;  %p935_p5 = por %p934_p4, %p933_p3 }
  0x30   :  { %v63_v14 = vadd.f32 1.0, %v748_v13  ;;  %p936_p6 = pnand %p935_p5, %p929_p2 }
  0x32   :  { %v65_v15 = vmul.f32 2.5, %v63_v14 }
  0x34   :  { %v66_v16 = vfloor.f32 %v65_v15 }
  0x36   :  { %v67_v17 = vmin.f32 %v66_v16, 4.0  ;;  %v69_v18 = vsub.f32 %v65_v15, %v66_v16 }
  0x38   :  { %v874_v19 = vtrunc.f32 %v67_v17  ;;  %v70_v20 = vmul.f32 %v69_v18, %v69_v18  ;;  %v75_v24 = vmul.f32 3.0, %v69_v18 }
  0x3a   :  { %v71_v21 = vmul.f32 %v70_v20, %v69_v18  ;;  %v73_v22 = vmul.f32 3.0, %v70_v20  ;;  %v80_v23 = vmul.f32 6.0, %v70_v20  ;;  %v1034_v25 = vcvt.f32.s32 %v874_v19 }
  0x3c   :  { %v72_v26 = vsub.f32 0.0, %v71_v21  ;;  %v79_v27 = vmul.f32 3.0, %v71_v21  ;;  %v84_v28 = vmul.f32 -3.0, %v71_v21  ;;  %v1036_v32 = vmul.f32 0.16666667, %v71_v21 }
  0x3d   :  { %vm95_vm1 = vcmp.eq.s32.totalorder %v1034_v25, 1  ;;  %vm90_vm2 = vcmp.eq.s32.totalorder %v1034_v25, 0  ;;  %vm249_vm4 = vcmp.eq.s32.totalorder %v1034_v25, 2  ;;  %vm331_vm5 = vcmp.eq.s32.totalorder %v1034_v25, 3 }
  0x3e   :  { %v74_v29 = vadd.f32 %v73_v22, %v72_v26  ;;  %v81_v30 = vsub.f32 %v79_v27, %v80_v23  ;;  %v85_v31 = vadd.f32 %v84_v28, %v73_v22  ;;  %v410_v42 = vsel %vm95_vm1, %v1036_v32, 0.0 }
  0x3f   :  { %vm413_vm6 = vcmp.eq.s32.totalorder %v1034_v25, 4  ;;  %v492_v53 = vsel %vm249_vm4, %v1036_v32, 0.0  ;;  %v572_v5 = vsel %vm331_vm5, %v1036_v32, 0.0  ;;  %v328_v8 = vsel %vm90_vm2, %v1036_v32, 0.0 }
  0x40   :  { %v76_v33 = vsub.f32 %v74_v29, %v75_v24  ;;  %v82_v34 = vadd.f32 4.0, %v81_v30  ;;  %v86_v35 = vadd.f32 %v85_v31, %v75_v24  ;;  %v651_v15 = vsel %vm413_vm6, %v1036_v32, 0.0 }
  0x42   :  { %v77_v38 = vadd.f32 1.0, %v76_v33  ;;  %v83_v39 = vmul.f32 0.16666667, %v82_v34  ;;  %v87_v40 = vadd.f32 1.0, %v86_v35 }
  0x44   :  { %v78_v45 = vmul.f32 0.16666667, %v77_v38  ;;  %v94_v46 = vsel %vm90_vm2, %v83_v39, 0.0  ;;  %v88_v47 = vmul.f32 0.16666667, %v87_v40 }
  0x46   :  { %v96_v48 = vsel %vm95_vm1, %v78_v45, %v94_v46  ;;  %v411_v49 = vsel %vm249_vm4, %v88_v47, %v410_v42  ;;  %v493_v56 = vsel %vm331_vm5, %v88_v47, %v492_v53  ;;  %v91_v59 = vsel %vm90_vm2, %v78_v45, 0.0 }
  0x47   :  { %786 = vmatmul.mubr.msk.f32.vlgmr.msra.gmra.mrb[0].mxu1 %vm100_vm3, %v96_v48  ;;  %v412_v51 = vsel %vm331_vm5, %v83_v39, %v411_v49  ;;  %v494_v61 = vsel %vm413_vm6, %v83_v39, %v493_v56  ;;  %v247_v63 = vsel %vm90_vm2, %v88_v47, 0.0  ;;  %v573_v11 = vsel %vm413_vm6, %v88_v47, %v572_v5 }
  0x48   :  { %842 = vmatpush3.bf16.msra.mxu1 %v841_v41  ;;  %v414_v52 = vsel %vm413_vm6, %v78_v45, %v412_v51  ;;  %792 = vmatprep.mubr.msk.f32.mxu1 %vm961_vm0, %v962_v1  ;;  %v248_v2 = vsel %vm95_vm1, %v83_v39, %v247_v63 }
  0x49   :  { %814 = vmatmul.mubr.msk.f32.vlgmr.msra.gmra.mrb[0].mxu0 %vm100_vm3, %v414_v52  ;;  %843 = vmatprep.subr.bf16.mxu1 %v960_v0  ;;  %v250_v9 = vsel %vm249_vm4, %v78_v45, %v248_v2 }
  0x4a   :  { %854 = vmatpush3.bf16.msra.mxu0 %v853_v50  ;;  %820 = vmatprep.mubr.msk.f32.mxu0 %vm961_vm0, %v962_v1 }
  0x4b   :  { %855 = vmatprep.subr.bf16.mxu0 %v960_v0 }
  0x4f   :  { %793 = vmatmul.mubr.msk.f32.vlgmr.msra.gmra.mrb[0].mxu1 %vm100_vm3, %v91_v59 }
  0x50   :  { %845 = vmatpush3.bf16.msra.mxu1 %v844_v60  ;;  %799 = vmatprep.mubr.msk.f32.mxu1 %vm961_vm0, %v962_v1 }
  0x51   :  { %821 = vmatmul.mubr.msk.f32.vlgmr.msra.gmra.mrb[0].mxu0 %vm100_vm3, %v494_v61  ;;  %846 = vmatprep.subr.bf16.mxu1 %v960_v0 }
  0x52   :  { %857 = vmatpush3.bf16.msra.mxu0 %v856_v62  ;;  %827 = vmatprep.mubr.msk.f32.mxu0 %vm961_vm0, %v962_v1 }
  0x53   :  { %858 = vmatprep.subr.bf16.mxu0 %v960_v0  ;;  %v329_v0 = vsel %vm95_vm1, %v88_v47, %v328_v8 }
  0x54   :  { %v330_v13 = vsel %vm249_vm4, %v83_v39, %v329_v0 }
  0x55   :  { %v332_v14 = vsel %vm331_vm5, %v78_v45, %v330_v13 }
  0x57   :  { %800 = vmatmul.mubr.msk.f32.vlgmr.msra.gmra.mrb[0].mxu1 %vm100_vm3, %v250_v9 }
  0x58   :  { %848 = vmatpush3.bf16.msra.mxu1 %v847_v10  ;;  %806 = vmatprep.mubr.msk.f32.mxu1 %vm961_vm0, %v962_v1 }
  0x59   :  { %828 = vmatmul.mubr.msk.f32.vlgmr.msra.gmra.mrb[0].mxu0 %vm100_vm3, %v573_v11 }
  0x5a   :  { %860 = vmatpush3.bf16.msra.mxu0 %v859_v12  ;;  %834 = vmatprep.mubr.msk.f32.mxu0 %vm961_vm0, %v962_v1 }
  0x5f   :  { %807 = vmatmul.mubr.msk.f32.vlgmr.msra.gmra.mrb[0].mxu1 %vm100_vm3, %v332_v14 }
  0x61   :  { %835 = vmatmul.mubr.msk.f32.vlgmr.msra.gmra.mrb[0].mxu0 %vm100_vm3, %v651_v15 }
 0x132   :  { %v405_v16 = vpop.f32.mrb[0].mxu1 }
 0x133   :  { %v808_v17 = vpop.f32.mrb[1].mxu1 }
 0x134   :  { %v724_v18 = vpop.f32.mrb[0].mxu0 }
 0x135   :  { %v861_v19 = vadd.f32 %v724_v18, %v405_v16  ;;  %v836_v20 = vpop.f32.mrb[1].mxu0 }
 0x137   :  { %729 = vst [vmem:[#allocation7] sm:$0xff] %v861_v19 }
 0x138   :  { %939 = shalt.err (!%p936_p6)
}
 0x139   :  { %s940_s20 = scalar_lea.hbm %s1128_s4, 128 }
 0x13a   :  { %p941_p7 = scmp.ne.s32.totalorder %s1128_s4, %s940_s20  ;;  %p944_p8 = scmp.lt.u32.totalorder %s940_s20, %s1128_s4 }
 0x13c   :  { %p946_p9 = pnand %p944_p8, %p941_p7 }
 0x13e   :  { %949 = shalt.err (!%p946_p9)
}
 0x13f   :  { %739 = dma.vmem_to_hbm [thread:$0]  %s737_s2, 128, %s1128_s4, [#allocation4]  }
 0x140   :  { %954 = dma.done.wait [#allocation4], 128  }
 0x141   :  { %955 = vsyncadd [#allocation4], 4294967168 }
 0x142   :  { %743 = vsyncpa [#allocation3], 1 }
 0x143   :  { %744 = vsyncpa [#allocation6], 1 }
 0x144   :  { %745 = vsyncpa [#allocation4], 1 }

</bundles_post_ra>
